<compile_context>
chip_gen: v6e
topology: v6e:2x2x1
jax: 0.10.0
libtpu: 0.0.40
codegen_flags: <defaults>
</compile_context>

<pallas_src>
import functools

import jax
import jax.numpy as jnp
from jax import lax
from jax.experimental import pallas as pl
from jax.experimental.pallas import tpu as pltpu


def _frame_warp_kernel(x_ref, flo_ref, out_ref, *, C, H, W, TM):
    """One (batch b, output-pixel tile m) grid step.

    x_ref   : (C*H, W)  all input rows for this batch (bf16, resident across m)
    flo_ref : (2, TM)   flow (dx, dy) for this output tile, lane-dense
    out_ref : (C, TM)   warped + masked output tile
    """
    m = pl.program_id(1)

    # ---- output-pixel coordinates for this tile, lane-dense (1, TM) f32 ----
    # Exact in f32 while H*W < 2^24 (~4k x 4k frames).
    lane = lax.broadcasted_iota(jnp.int32, (1, TM), 1).astype(jnp.float32)
    p = (m * TM).astype(jnp.float32) + lane
    yy = jnp.floor(p / W)                       # output row
    xx = p - yy * W                             # output column

    fx = flo_ref[0:1, :].astype(jnp.float32)    # flow along width
    fy = flo_ref[1:2, :].astype(jnp.float32)    # flow along height

    # Module normalization (align_corners=True style) followed by
    # grid_sample's align_corners=False un-normalization, algebraically fused:
    #   ix = (xx + fx) * W / (W - 1) - 0.5
    ix = (xx + fx) * (W / max(W - 1, 1)) - 0.5
    iy = (yy + fy) * (H / max(H - 1, 1)) - 0.5

    x0 = jnp.floor(ix)
    x1 = x0 + 1.0
    y0 = jnp.floor(iy)
    y1 = y0 + 1.0
    wx1 = ix - x0
    wx0 = 1.0 - wx1
    wy1 = iy - y0
    wy0 = 1.0 - wy1

    # zeros padding: an out-of-bounds corner contributes nothing.
    def masked(w, c, lim):
        return jnp.where((c >= 0.0) & (c <= lim), w, 0.0)

    wx0 = masked(wx0, x0, W - 1.0)
    wx1 = masked(wx1, x1, W - 1.0)
    wy0 = masked(wy0, y0, H - 1.0)
    wy1 = masked(wy1, y1, H - 1.0)

    # ---- separable interpolation matrices, f32, 2 nonzeros per column ----
    # (an out-of-range corner index matches no row; its weight is already 0,
    #  so no clipping is needed at all)
    w_iota = lax.broadcasted_iota(jnp.int32, (W, 1), 0).astype(jnp.float32)
    h_iota = lax.broadcasted_iota(jnp.int32, (H, 1), 0).astype(jnp.float32)
    cmat = jnp.where(w_iota == x0, wx0, 0.0) + jnp.where(w_iota == x1, wx1, 0.0)
    rmat = jnp.where(h_iota == y0, wy0, 0.0) + jnp.where(h_iota == y1, wy1, 0.0)

    # ---- stage 1 (MXU): contract W.  u[c*H+h, p] = sum_w x[c,h,w]*cmat[w,p]
    # Single bf16 cast of the finished f32 matrix, f32 accumulation.
    u = jnp.dot(x_ref[...], cmat.astype(jnp.bfloat16),
                preferred_element_type=jnp.float32)          # (C*H, TM) f32

    # ---- validity mask (grid_sample of ones >= 0.9999), also separable ----
    wsum = (wx0 + wx1) * (wy0 + wy1)                         # (1, TM) f32
    mask = (wsum >= 0.9999).astype(jnp.float32)
    rmask = rmat * mask                                      # fold mask into R

    # ---- stage 2 (VPU/XLU): contract H per channel (static unroll, small C)
    chans = [
        jnp.sum(u[c * H:(c + 1) * H, :] * rmask, axis=0, keepdims=True)
        for c in range(C)
    ]
    out_ref[...] = jnp.concatenate(chans, axis=0).astype(out_ref.dtype)


def frame_warper(x, flo, *, tile_m=512):
    """Backward-warp x by flow flo (FrameWarper.forward).

    x   : (B, C, H, W)
    flo : (B, 2, H, W)  -- flo[:, 0] = dx (width), flo[:, 1] = dy (height)
    """
    B, C, H, W = x.shape
    HW = H * W

    # Pad the output-pixel axis up to a multiple of 128 (lane-aligned blocks,
    # graceful handling of odd H*W).  Padded pixels land out of bounds and are
    # zeroed by the validity mask; we slice them away afterwards.
    HW_pad = max(128, ((HW + 127) // 128) * 128)

    def pick(t):
        # largest multiple-of-128 divisor of HW_pad that is <= t
        t = max(128, min(t, HW_pad))
        t -= t % 128
        while HW_pad % t != 0:
            t -= 128
        return t

    TM = pick(tile_m)

    # Input rows (C*H rows of W pixels) in bf16: MXU-native dtype, halves the
    # HBM traffic and the resident-VMEM footprint.  Accumulation stays f32.
    x_rows = x.reshape(B, C * H, W).astype(jnp.bfloat16)
    flo_flat = flo.reshape(B, 2, HW)
    if HW_pad != HW:
        flo_flat = jnp.pad(flo_flat, ((0, 0), (0, 0), (0, HW_pad - HW)))

    kernel = functools.partial(_frame_warp_kernel, C=C, H=H, W=W, TM=TM)
    grid = (B, HW_pad // TM)

    # True cost (XLA cannot infer it from shapes): stage-1 matmuls dominate.
    flops = 2 * B * (C * H) * W * HW_pad
    bytes_accessed = (B * C * H * W * x_rows.dtype.itemsize   # x: once per batch
                      + B * 2 * HW_pad * flo.dtype.itemsize    # flow
                      + B * C * HW_pad * x.dtype.itemsize)     # output
    cost = pl.CostEstimate(flops=flops, transcendentals=B * HW_pad,
                           bytes_accessed=bytes_accessed)

    # Explicit VMEM budget (v7x has only 64 MiB per TensorCore): resident x
    # (double-buffered, lane-padded), flow/out blocks, the (C*H, TM) stage-1
    # result and the small interpolation matrices / coordinate temporaries.
    est = (2 * (C * H) * max(W, 128) * 2
           + 2 * 2 * TM * 4 + 2 * C * TM * 4
           + (C * H) * TM * 4
           + (H + W + 32) * TM * 4)
    vmem_limit = int(min(128 * 2 ** 20, max(32 * 2 ** 20, 4 * est)))

    out = pl.pallas_call(
        kernel,
        out_shape=jax.ShapeDtypeStruct((B, C, HW_pad), x.dtype),
        grid_spec=pltpu.PrefetchScalarGridSpec(
            num_scalar_prefetch=0,
            grid=grid,
            in_specs=[
                # x: index map ignores m -> resident, DMA'd once per batch
                pl.BlockSpec((None, C * H, W), lambda b, m: (b, 0, 0)),
                # flow: lane-dense (2, TM) block per output tile
                pl.BlockSpec((None, 2, TM), lambda b, m: (b, 0, m)),
            ],
            out_specs=pl.BlockSpec((None, C, TM), lambda b, m: (b, 0, m)),
        ),
        compiler_params=pltpu.CompilerParams(
            dimension_semantics=("parallel", "parallel"),
            vmem_limit_bytes=vmem_limit),
        cost_estimate=cost,
    )(x_rows, flo_flat)

    return out[:, :, :HW].reshape(B, C, H, W)


def frame_warper_ref(x, flo):
    """Pure-JAX reference with identical semantics (for verification)."""
    B, C, H, W = x.shape
    HW = H * W
    yy, xx = jnp.meshgrid(jnp.arange(H, dtype=jnp.float32),
                          jnp.arange(W, dtype=jnp.float32), indexing="ij")
    ix = (xx[None] + flo[:, 0]) * (W / max(W - 1, 1)) - 0.5
    iy = (yy[None] + flo[:, 1]) * (H / max(H - 1, 1)) - 0.5
    x0 = jnp.floor(ix); x1 = x0 + 1.0
    y0 = jnp.floor(iy); y1 = y0 + 1.0
    wx1 = ix - x0; wx0 = 1.0 - wx1
    wy1 = iy - y0; wy0 = 1.0 - wy1
    xf = x.reshape(B, C, HW)

    def gather(xc, yc, w):
        valid = ((xc >= 0) & (xc <= W - 1) & (yc >= 0) & (yc <= H - 1))
        xi = jnp.clip(xc, 0, W - 1).astype(jnp.int32)
        yi = jnp.clip(yc, 0, H - 1).astype(jnp.int32)
        idx = (yi * W + xi).reshape(B, 1, HW)
        idx = jnp.broadcast_to(idx, (B, C, HW))
        vals = jnp.take_along_axis(xf, idx, axis=2).reshape(B, C, H, W)
        wv = jnp.where(valid, w, 0.0)
        return vals * wv[:, None], wv

    o00, m00 = gather(x0, y0, wx0 * wy0)
    o10, m10 = gather(x1, y0, wx1 * wy0)
    o01, m01 = gather(x0, y1, wx0 * wy1)
    o11, m11 = gather(x1, y1, wx1 * wy1)
    out = o00 + o10 + o01 + o11
    mask = ((m00 + m10 + m01 + m11) >= 0.9999).astype(jnp.float32)
    return out * mask[:, None]


if __name__ == "__main__":
    key = jax.random.PRNGKey(0)
    kx, kf = jax.random.split(key)
    B, C, H, W = 2, 4, 16, 16
    x = jax.random.normal(kx, (B, C, H, W), dtype=jnp.float32)
    # flow in pixels, moderate magnitude so some samples fall out of bounds
    flo = 3.0 * jax.random.normal(kf, (B, 2, H, W), dtype=jnp.float32)

    ref = frame_warper_ref(x, flo)

    # Small tile (HW=256, TM=128) -> grid (2, 2): exercises multiple output
    # tiles per batch with x held resident across them.
    out = frame_warper(x, flo, tile_m=128)
    jax.block_until_ready(out)
    assert out.shape == (B, C, H, W)
    # x and the W-interpolation matrix feed the MXU in bf16 (f32 accumulation,
    # f32 H-interpolation and mask); tolerance reflects bf16 input rounding.
    assert jnp.allclose(out, ref, atol=2e-2, rtol=2e-2), "mismatch vs reference (TM=128)"

    # Default tile (single output tile per batch) must give the same result.
    out2 = frame_warper(x, flo)
    jax.block_until_ready(out2)
    assert jnp.allclose(out2, ref, atol=2e-2, rtol=2e-2), "mismatch vs reference (default)"

    print("KERNEL_OK")
</pallas_src>

<mosaic_0001>
module attributes {stable_mosaic.version = 11 : i64} {
  func.func @_frame_warp_kernel(%arg0: i32, %arg1: i32, %arg2: memref<1x64x16xbf16, #tpu.memory_space<vmem>>, %arg3: memref<1x2x128xf32, #tpu.memory_space<vmem>>, %arg4: memref<1x4x128xf32, #tpu.memory_space<vmem>>) attributes {dimension_semantics = [#tpu.dimension_semantics<parallel>, #tpu.dimension_semantics<parallel>], iteration_bounds = array<i64: 2, 2>, scalar_prefetch = 0 : i64, scratch_operands = 0 : i64, tpu.core_type = #tpu.core_type<tc>, window_params = [{transform_indices = @transform_0, window_bounds = array<i64: 1, 64, 16>}, {transform_indices = @transform_1, window_bounds = array<i64: 1, 2, 128>}, {transform_indices = @transform_2, window_bounds = array<i64: 1, 4, 128>}]} {
    %0 = tpu.iota {dimensions = array<i32: 1>} : vector<1x128xi32>
    %1 = arith.sitofp %0 : vector<1x128xi32> to vector<1x128xf32>
    %c128_i32 = arith.constant 128 : i32
    %2 = arith.muli %arg1, %c128_i32 : i32
    %3 = arith.sitofp %2 : i32 to f32
    %4 = vector.broadcast %3 : f32 to vector<1x128xf32>
    %5 = arith.addf %4, %1 : vector<1x128xf32>
    %cst = arith.constant 1.600000e+01 : f32
    %6 = vector.broadcast %cst : f32 to vector<1x128xf32>
    %7 = arith.divf %5, %6 : vector<1x128xf32>
    %8 = math.floor %7 : vector<1x128xf32>
    %cst_0 = arith.constant 1.600000e+01 : f32
    %9 = vector.broadcast %cst_0 : f32 to vector<1x128xf32>
    %10 = arith.mulf %8, %9 : vector<1x128xf32>
    %11 = arith.subf %5, %10 : vector<1x128xf32>
    %c0 = arith.constant 0 : index
    %c0_1 = arith.constant 0 : index
    %c0_2 = arith.constant 0 : index
    %12 = vector.load %arg3[%c0, %c0_1, %c0_2] : memref<1x2x128xf32, #tpu.memory_space<vmem>>, vector<1x1x128xf32>
    %13 = vector.shape_cast %12 : vector<1x1x128xf32> to vector<1x128xf32>
    %c0_3 = arith.constant 0 : index
    %c1 = arith.constant 1 : index
    %c0_4 = arith.constant 0 : index
    %14 = vector.load %arg3[%c0_3, %c1, %c0_4] : memref<1x2x128xf32, #tpu.memory_space<vmem>>, vector<1x1x128xf32>
    %15 = vector.shape_cast %14 : vector<1x1x128xf32> to vector<1x128xf32>
    %16 = arith.addf %11, %13 : vector<1x128xf32>
    %cst_5 = arith.constant 1.06666672 : f32
    %17 = vector.broadcast %cst_5 : f32 to vector<1x128xf32>
    %18 = arith.mulf %16, %17 : vector<1x128xf32>
    %cst_6 = arith.constant 5.000000e-01 : f32
    %19 = vector.broadcast %cst_6 : f32 to vector<1x128xf32>
    %20 = arith.subf %18, %19 : vector<1x128xf32>
    %21 = arith.addf %8, %15 : vector<1x128xf32>
    %cst_7 = arith.constant 1.06666672 : f32
    %22 = vector.broadcast %cst_7 : f32 to vector<1x128xf32>
    %23 = arith.mulf %21, %22 : vector<1x128xf32>
    %cst_8 = arith.constant 5.000000e-01 : f32
    %24 = vector.broadcast %cst_8 : f32 to vector<1x128xf32>
    %25 = arith.subf %23, %24 : vector<1x128xf32>
    %26 = math.floor %20 : vector<1x128xf32>
    %cst_9 = arith.constant 1.000000e+00 : f32
    %27 = vector.broadcast %cst_9 : f32 to vector<1x128xf32>
    %28 = arith.addf %26, %27 : vector<1x128xf32>
    %29 = math.floor %25 : vector<1x128xf32>
    %cst_10 = arith.constant 1.000000e+00 : f32
    %30 = vector.broadcast %cst_10 : f32 to vector<1x128xf32>
    %31 = arith.addf %29, %30 : vector<1x128xf32>
    %32 = arith.subf %20, %26 : vector<1x128xf32>
    %cst_11 = arith.constant 1.000000e+00 : f32
    %33 = vector.broadcast %cst_11 : f32 to vector<1x128xf32>
    %34 = arith.subf %33, %32 : vector<1x128xf32>
    %35 = arith.subf %25, %29 : vector<1x128xf32>
    %cst_12 = arith.constant 1.000000e+00 : f32
    %36 = vector.broadcast %cst_12 : f32 to vector<1x128xf32>
    %37 = arith.subf %36, %35 : vector<1x128xf32>
    %cst_13 = arith.constant 0.000000e+00 : f32
    %38 = vector.broadcast %cst_13 : f32 to vector<1x128xf32>
    %39 = arith.cmpf oge, %26, %38 : vector<1x128xf32>
    %cst_14 = arith.constant 1.500000e+01 : f32
    %40 = vector.broadcast %cst_14 : f32 to vector<1x128xf32>
    %41 = arith.cmpf ole, %26, %40 : vector<1x128xf32>
    %42 = arith.andi %39, %41 : vector<1x128xi1>
    %cst_15 = arith.constant 0.000000e+00 : f32
    %43 = vector.broadcast %cst_15 : f32 to vector<1x128xf32>
    %44 = arith.select %42, %34, %43 : vector<1x128xi1>, vector<1x128xf32>
    %cst_16 = arith.constant 0.000000e+00 : f32
    %45 = vector.broadcast %cst_16 : f32 to vector<1x128xf32>
    %46 = arith.cmpf oge, %28, %45 : vector<1x128xf32>
    %cst_17 = arith.constant 1.500000e+01 : f32
    %47 = vector.broadcast %cst_17 : f32 to vector<1x128xf32>
    %48 = arith.cmpf ole, %28, %47 : vector<1x128xf32>
    %49 = arith.andi %46, %48 : vector<1x128xi1>
    %cst_18 = arith.constant 0.000000e+00 : f32
    %50 = vector.broadcast %cst_18 : f32 to vector<1x128xf32>
    %51 = arith.select %49, %32, %50 : vector<1x128xi1>, vector<1x128xf32>
    %cst_19 = arith.constant 0.000000e+00 : f32
    %52 = vector.broadcast %cst_19 : f32 to vector<1x128xf32>
    %53 = arith.cmpf oge, %29, %52 : vector<1x128xf32>
    %cst_20 = arith.constant 1.500000e+01 : f32
    %54 = vector.broadcast %cst_20 : f32 to vector<1x128xf32>
    %55 = arith.cmpf ole, %29, %54 : vector<1x128xf32>
    %56 = arith.andi %53, %55 : vector<1x128xi1>
    %cst_21 = arith.constant 0.000000e+00 : f32
    %57 = vector.broadcast %cst_21 : f32 to vector<1x128xf32>
    %58 = arith.select %56, %37, %57 : vector<1x128xi1>, vector<1x128xf32>
    %cst_22 = arith.constant 0.000000e+00 : f32
    %59 = vector.broadcast %cst_22 : f32 to vector<1x128xf32>
    %60 = arith.cmpf oge, %31, %59 : vector<1x128xf32>
    %cst_23 = arith.constant 1.500000e+01 : f32
    %61 = vector.broadcast %cst_23 : f32 to vector<1x128xf32>
    %62 = arith.cmpf ole, %31, %61 : vector<1x128xf32>
    %63 = arith.andi %60, %62 : vector<1x128xi1>
    %cst_24 = arith.constant 0.000000e+00 : f32
    %64 = vector.broadcast %cst_24 : f32 to vector<1x128xf32>
    %65 = arith.select %63, %35, %64 : vector<1x128xi1>, vector<1x128xf32>
    %66 = tpu.iota {dimensions = array<i32: 0>} : vector<16x1xi32>
    %67 = arith.sitofp %66 : vector<16x1xi32> to vector<16x1xf32>
    %68 = tpu.iota {dimensions = array<i32: 0>} : vector<16x1xi32>
    %69 = arith.sitofp %68 : vector<16x1xi32> to vector<16x1xf32>
    %70 = vector.broadcast %67 : vector<16x1xf32> to vector<16x128xf32>
    %71 = vector.broadcast %26 : vector<1x128xf32> to vector<16x128xf32>
    %72 = arith.cmpf oeq, %70, %71 : vector<16x128xf32>
    %cst_25 = arith.constant 0.000000e+00 : f32
    %73 = vector.shape_cast %44 : vector<1x128xf32> to vector<1x128xf32>
    %74 = vector.broadcast %73 : vector<1x128xf32> to vector<16x128xf32>
    %75 = vector.broadcast %cst_25 : f32 to vector<16x128xf32>
    %76 = arith.select %72, %74, %75 : vector<16x128xi1>, vector<16x128xf32>
    %77 = vector.broadcast %67 : vector<16x1xf32> to vector<16x128xf32>
    %78 = vector.broadcast %28 : vector<1x128xf32> to vector<16x128xf32>
    %79 = arith.cmpf oeq, %77, %78 : vector<16x128xf32>
    %cst_26 = arith.constant 0.000000e+00 : f32
    %80 = vector.shape_cast %51 : vector<1x128xf32> to vector<1x128xf32>
    %81 = vector.broadcast %80 : vector<1x128xf32> to vector<16x128xf32>
    %82 = vector.broadcast %cst_26 : f32 to vector<16x128xf32>
    %83 = arith.select %79, %81, %82 : vector<16x128xi1>, vector<16x128xf32>
    %84 = arith.addf %76, %83 : vector<16x128xf32>
    %85 = vector.broadcast %69 : vector<16x1xf32> to vector<16x128xf32>
    %86 = vector.broadcast %29 : vector<1x128xf32> to vector<16x128xf32>
    %87 = arith.cmpf oeq, %85, %86 : vector<16x128xf32>
    %cst_27 = arith.constant 0.000000e+00 : f32
    %88 = vector.shape_cast %58 : vector<1x128xf32> to vector<1x128xf32>
    %89 = vector.broadcast %88 : vector<1x128xf32> to vector<16x128xf32>
    %90 = vector.broadcast %cst_27 : f32 to vector<16x128xf32>
    %91 = arith.select %87, %89, %90 : vector<16x128xi1>, vector<16x128xf32>
    %92 = vector.broadcast %69 : vector<16x1xf32> to vector<16x128xf32>
    %93 = vector.broadcast %31 : vector<1x128xf32> to vector<16x128xf32>
    %94 = arith.cmpf oeq, %92, %93 : vector<16x128xf32>
    %cst_28 = arith.constant 0.000000e+00 : f32
    %95 = vector.shape_cast %65 : vector<1x128xf32> to vector<1x128xf32>
    %96 = vector.broadcast %95 : vector<1x128xf32> to vector<16x128xf32>
    %97 = vector.broadcast %cst_28 : f32 to vector<16x128xf32>
    %98 = arith.select %94, %96, %97 : vector<16x128xi1>, vector<16x128xf32>
    %99 = arith.addf %91, %98 : vector<16x128xf32>
    %c0_29 = arith.constant 0 : index
    %c0_30 = arith.constant 0 : index
    %c0_31 = arith.constant 0 : index
    %100 = vector.load %arg2[%c0_29, %c0_30, %c0_31] : memref<1x64x16xbf16, #tpu.memory_space<vmem>>, vector<1x64x16xbf16>
    %101 = vector.shape_cast %100 : vector<1x64x16xbf16> to vector<64x16xbf16>
    %102 = arith.truncf %84 : vector<16x128xf32> to vector<16x128xbf16>
    %cst_32 = arith.constant dense<0.000000e+00> : vector<64x128xf32>
    %103 = tpu.matmul %101, %102, %cst_32 {dimension_numbers = #tpu.dot_dimension_numbers<[1], [0], [0], [1], [0, 0, 1, 1], [], []>} : vector<64x16xbf16>, vector<16x128xbf16>, vector<64x128xf32> -> vector<64x128xf32>
    %104 = arith.addf %44, %51 : vector<1x128xf32>
    %105 = arith.addf %58, %65 : vector<1x128xf32>
    %106 = arith.mulf %104, %105 : vector<1x128xf32>
    %cst_33 = arith.constant 0.999899983 : f32
    %107 = vector.broadcast %cst_33 : f32 to vector<1x128xf32>
    %108 = arith.cmpf oge, %106, %107 : vector<1x128xf32>
    %109 = arith.extui %108 : vector<1x128xi1> to vector<1x128xi32>
    %110 = arith.sitofp %109 : vector<1x128xi32> to vector<1x128xf32>
    %111 = vector.broadcast %110 : vector<1x128xf32> to vector<16x128xf32>
    %112 = arith.mulf %99, %111 : vector<16x128xf32>
    %113 = vector.extract_strided_slice %103 {offsets = [0, 0], sizes = [16, 128], strides = [1, 1]} : vector<64x128xf32> to vector<16x128xf32>
    %114 = arith.mulf %113, %112 : vector<16x128xf32>
    %cst_34 = arith.constant dense<0.000000e+00> : vector<128xf32>
    %115 = vector.multi_reduction <add>, %114, %cst_34 [0] : vector<16x128xf32> to vector<128xf32>
    %116 = vector.shape_cast %115 : vector<128xf32> to vector<1x128xf32>
    %117 = vector.extract_strided_slice %103 {offsets = [16, 0], sizes = [16, 128], strides = [1, 1]} : vector<64x128xf32> to vector<16x128xf32>
    %118 = arith.mulf %117, %112 : vector<16x128xf32>
    %cst_35 = arith.constant dense<0.000000e+00> : vector<128xf32>
    %119 = vector.multi_reduction <add>, %118, %cst_35 [0] : vector<16x128xf32> to vector<128xf32>
    %120 = vector.shape_cast %119 : vector<128xf32> to vector<1x128xf32>
    %121 = vector.extract_strided_slice %103 {offsets = [32, 0], sizes = [16, 128], strides = [1, 1]} : vector<64x128xf32> to vector<16x128xf32>
    %122 = arith.mulf %121, %112 : vector<16x128xf32>
    %cst_36 = arith.constant dense<0.000000e+00> : vector<128xf32>
    %123 = vector.multi_reduction <add>, %122, %cst_36 [0] : vector<16x128xf32> to vector<128xf32>
    %124 = vector.shape_cast %123 : vector<128xf32> to vector<1x128xf32>
    %125 = vector.extract_strided_slice %103 {offsets = [48, 0], sizes = [16, 128], strides = [1, 1]} : vector<64x128xf32> to vector<16x128xf32>
    %126 = arith.mulf %125, %112 : vector<16x128xf32>
    %cst_37 = arith.constant dense<0.000000e+00> : vector<128xf32>
    %127 = vector.multi_reduction <add>, %126, %cst_37 [0] : vector<16x128xf32> to vector<128xf32>
    %128 = vector.shape_cast %127 : vector<128xf32> to vector<1x128xf32>
    %129 = tpu.concatenate %116, %120, %124, %128 in 0 : vector<1x128xf32>, vector<1x128xf32>, vector<1x128xf32>, vector<1x128xf32> -> vector<4x128xf32>
    %c0_38 = arith.constant 0 : index
    %c0_39 = arith.constant 0 : index
    %c0_40 = arith.constant 0 : index
    %130 = vector.load %arg4[%c0_38, %c0_39, %c0_40] : memref<1x4x128xf32, #tpu.memory_space<vmem>>, vector<1x4x128xf32>
    %131 = vector.shape_cast %130 : vector<1x4x128xf32> to vector<4x128xf32>
    %132 = vector.shape_cast %129 : vector<4x128xf32> to vector<1x4x128xf32>
    tpu.vector_store %arg4[%c0_38, %c0_39, %c0_40], %132 {strides = array<i32>} : memref<1x4x128xf32, #tpu.memory_space<vmem>>, vector<1x4x128xf32>,
    return
  }
  func.func @transform_0(%arg0: i32, %arg1: i32) -> (i32, i32, i32) {
    %c0_i32 = arith.constant 0 : i32
    %c0_i32_0 = arith.constant 0 : i32
    %c0_i32_1 = arith.constant 0 : i32
    return %arg0, %c0_i32, %c0_i32_0 : i32, i32, i32
  }
  func.func @transform_1(%arg0: i32, %arg1: i32) -> (i32, i32, i32) {
    %c0_i32 = arith.constant 0 : i32
    %c0_i32_0 = arith.constant 0 : i32
    return %arg0, %c0_i32, %arg1 : i32, i32, i32
  }
  func.func @transform_2(%arg0: i32, %arg1: i32) -> (i32, i32, i32) {
    %c0_i32 = arith.constant 0 : i32
    %c0_i32_0 = arith.constant 0 : i32
    return %arg0, %c0_i32, %arg1 : i32, i32, i32
  }
}

</mosaic_0001>

<bundles_post_ra>
// kernel: tpu_custom_call.1
= control target key start
LH: loop header
LB: loop body
LE: loop exit
PB: predicated region body
PF: predicated region fallthrough
CT: control target
= control target key end

     0   :  { %7 = vsyncpa [#allocation3], 0  ;;  %s955_s0 = inlined_call_operand.vmem [shape: bf16[2,64,16], index: 0, kind: input, shape index: {}]   ;;  %s956_s1 = inlined_call_operand.vmem [shape: f32[2,2,256], index: 1, kind: input, shape index: {}]   ;;  %s957_s2 = inlined_call_operand.hbm [shape: f32[2,4,256], index: 2, kind: output, shape index: {}]  }
   0x1   :  { %9 = vsyncpa [#allocation3 + $0x1], 0  ;;  %s789_s9 = smov 0   ;;  %s791_s10 = smov 0  }
   0x2   :  { %s793_s11 = smov 0   ;;  %s795_s12 = smov 0  }
   0x3   :  { %s797_s13 = smov 0   ;;  %s799_s14 = smov 0  }
   0x4   :  { %s801_s15 = smov 0   ;;  %s803_s16 = smov 0  }
   0x5 LB: > { %s557_s17 = sadd.s32 4294967295, %s770_s16   ;;  %s558_s18 = sadd.s32 4294967294, %s770_s16   ;;  %s770_s16 = sphi %s803_s16, %s15_s16   ;;  %s766_s15 = sphi %s801_s15, %s966_s15   ;;  %s762_s14 = sphi %s799_s14, %s965_s14   ;;  %s758_s13 = sphi %s797_s13, %s964_s13   ;;  %s754_s12 = sphi %s795_s12, %s963_s12   ;;  %s750_s11 = sphi %s793_s11, %s962_s11   ;;  %s746_s10 = sphi %s791_s10, %s961_s10   ;;  %s742_s9 = sphi %s789_s9, %s960_s9  }
   0x6   : > { %s24_s19 = sadd.s32 1, %s762_s14  ;;  %s27_s20 = sadd.s32 1, %s766_s15 }
   0x7   : > { %p25_p0 = scmp.ge.s32.totalorder %s24_s19, 2  ;;  %p100_p1 = scmp.ne.s32.totalorder %s750_s11, %s746_s10 }
   0x8   : > { %p101_p2 = scmp.eq.s32.totalorder %s557_s17, 3  ;;  %p106_p5 = scmp.ne.s32.totalorder %s746_s10, %s742_s9 }
   0x9   : > { %s968_s19 = smov (%p25_p0, %s24_s19), 0  ;;  %s970_s20 = smov (!%p25_p0, %s27_s20), %s766_s15 }
   0xa   : > { %s86_s21 = ssub.s32 %s762_s14, %s968_s19  ;;  %p840_p3 = por %p101_p2, %p100_p1 }
   0xb   : > { %p29_p4 = scmp.ge.s32.totalorder %s970_s20, 2  ;;  %p107_p6 = scmp.eq.s32.totalorder %s558_s18, 3 }
   0xc   : > { %p561_p7 = scmp.ge.s32.totalorder %s770_s16, 1  ;;  %p144_p9 = scmp.lt.s32.totalorder %s770_s16, 5 }
   0xd   : > { %s972_s20 = smov (%p29_p4, %s970_s20), 0  ;;  %p849_p8 = por %p107_p6, %p106_p5 }
   0xe   : > { %s85_s24 = ssub.s32 %s766_s15, %s972_s20  ;;  %s90_s25 = sadd.s32 1, %s750_s11 }
   0xf   : > { %s87_s26 = sor.u32 %s86_s21, %s85_s24  ;;  %p145_p10 = pnand %p561_p7, %p144_p9 }
  0x10   : > { %p88_p11 = scmp.eq.s32.totalorder %s87_s26, 0  ;;  %p174_p12 = scmp.lt.s32.totalorder (!%p145_p10), %s758_s13, 1 }
  0x11   : > { %148 = sbr.rel (%p145_p10) target bundleno = 293 (0x125), region = 28  ;;  %p181_p13 = scmp.lt.s32.totalorder (!%p145_p10), %s754_s12, 1 }
  0x12   : > { %s858_s27 = scalar_select %p88_p11, %s750_s11, %s90_s25  }
  0x13   : > { %s567_s28 = sshll.u32 (!%p145_p10), %s754_s12, 7  ;;  %s171_s26 = sand.u32 (!%p145_p10), 1, %s746_s10  }
  0x14   : > { %s192_s4 = scvt.s32.f32 (!%p145_p10), %s567_s28  ;;  %s562_s28 = sshll.u32 (!%p145_p10), %s171_s26, 2 }
  0x15   : > { %s452_s7 = scalar_lea.sflag (!%p145_p10), [#allocation3], %s171_s26 }
  0x16   : > { %v188_v0 = vlaneseq  ;;  %s175_s29 = scalar_select %p174_p12, %s758_s13, 1  ;;  %v193_v3 = vstv %s192_s4  ;;  %vm318_vm0 = vcmask 130048   ;;  %v772_v59 = vmov 0.0  }
  0x17   : > { %s182_s30 = scalar_select %p181_p13, %s754_s12, 1 }
  0x18   : > { %v189_v1 = vand.u32 127, %v188_v0  ;;  %s565_s3 = sshll.u32 %s175_s29, 1  ;;  %s584_s6 = sshll.u32 %s175_s29, 5  ;;  %v233_v15 = vshrl.u32 %v188_v0, 7 }
  0x19   : > { %s184_s5 = sadd.s32 %s565_s3, %s182_s30  ;;  %s868_s17 = scalar_lea.vmem %s955_s0, %s584_s6 }
  0x1a   : > { %v190_v2 = vcvt.s32.f32 %v189_v1  ;;  %s566_s18 = sshll.u32 %s184_s5, 1  ;;  %v674_v5 = vld [vmem:[%s868_s17] sm:$0xff]   ;;  %v675_v7 = vld [vmem:[%s868_s17 + $0x10] sm:$0xff]   ;;  %v234_v20 = vadd.s32 8, %v233_v15  ;;  %v877_v21 = vsub.s32 0, %v233_v15  ;;  %v235_v25 = vcvt.s32.f32 %v233_v15  ;;  %v676_v55 = vld [vmem:[%s868_s17 + $0x8] sm:$0xff]  }
  0x1b   : > { %592 = vmatprep.mubr.msk.bf16.mxu0 %vm318_vm0, %v674_v5  ;;  %s186_s25 = scalar_lea.vmem %s956_s1, %s566_s18  ;;  %596 = vmatprep.mubr.msk.bf16.mxu1 %vm318_vm0, %v675_v7  ;;  %v677_v56 = vld [vmem:[%s868_s17 + $0x18] sm:$0xff]   ;;  %s580_s29 = sshll.u32 %s758_s13, 1 }
  0x1c   : > { %v194_v4 = vadd.f32 %v193_v3, %v190_v2  ;;  %v201_v9 = vld [vmem:[%s186_s25 + $0x1] sm:$0x1]  ;;  %v200_v12 = vld [vmem:[%s186_s25] sm:$0x1]  ;;  %v236_v29 = vcvt.s32.f32 %v234_v20  ;;  %s463_s30 = sadd.s32 %s754_s12, %s580_s29  ;;  %s173_s4 = scalar_lea.vmem [#allocation2], %s562_s28 }
  0x1d   : > { %s581_s3 = sshll.u32 %s463_s30, 6  ;;  %s467_s5 = sshll.u32 %s173_s4, 4  ;;  %s468_s5 = int_to_ptr.vmem [resolvable:$true] %s467_s5 }
  0x1e   : > { %v196_v6 = vmul.f32 0.0625, %v194_v4  ;;  %s907_s12 = scalar_lea.hbm %s957_s2, %s581_s3  ;;  %s678_s8 = scalar_lea.vmem %s468_s5, 64 }
  0x1f   : > { %p679_p0 = scmp.ne.s32.totalorder %s468_s5, %s678_s8  ;;  %s773_s17 = smov [#allocation2]  }
  0x20   : > { %v197_v8 = vfloor.f32 %v196_v6  ;;  %s682_s18 = sshll.u32 %s773_s17, 4  ;;  %s683_s18 = int_to_ptr.vmem [resolvable:$false] %s682_s18 }
  0x21   : > { %p680_p1 = pnand %p679_p0, %p840_p3  ;;  %s684_s21 = scalar_lea.vmem %s683_s18, 128 }
  0x22   : > { %v198_v10 = vmul.f32 16.0, %v197_v8  ;;  %v205_v11 = vadd.f32 %v201_v9, %v197_v8  ;;  %p685_p4 = scmp.lt.s32.totalorder %s468_s5, %s683_s18  ;;  %p686_p5 = scmp.lt.s32.totalorder %s684_s21, %s678_s8 }
  0x23   : > { %p681_p2 = pneg %p680_p1 }
  0x24   : > { %v199_v13 = vsub.f32 %v194_v4, %v198_v10  ;;  %v206_v14 = vmul.f32 1.0666667, %v205_v11  ;;  %p687_p6 = por %p686_p5, %p685_p4 }
  0x26   : > { %v202_v16 = vadd.f32 %v200_v12, %v199_v13  ;;  %v569_v17 = vadd.f32 -0.5, %v206_v14  ;;  %p688_p7 = pnand %p687_p6, %p681_p2 }
  0x28   : > { %v203_v18 = vmul.f32 1.0666667, %v202_v16  ;;  %v210_v19 = vfloor.f32 %v569_v17 }
  0x2a   : > { %v568_v22 = vadd.f32 -0.5, %v203_v18  ;;  %v211_v23 = vadd.f32 1.0, %v210_v19  ;;  %v214_v24 = vsub.f32 %v569_v17, %v210_v19  ;;  %vm224_vm1 = vcmp.ge.f32.partialorder %v210_v19, 0.0 }
  0x2b   : > { %vm225_vm2 = vcmp.le.f32.partialorder %v210_v19, 15.0  ;;  %v880_v26 = vrot.slane %v210_v19, %v877_v21 }
  0x2c   : > { %v208_v27 = vfloor.f32 %v568_v22  ;;  %v215_v28 = vsub.f32 1.0, %v214_v24  ;;  %vm226_vm3 = vmand %vm224_vm1, %vm225_vm2  ;;  %vm228_vm4 = vcmp.ge.f32.partialorder %v211_v23, 0.0  ;;  %vm229_vm5 = vcmp.le.f32.partialorder %v211_v23, 15.0 }
  0x2d   : > { %vm230_vm6 = vmand %vm228_vm4, %vm229_vm5  ;;  %vm267_vm7 = vcmp.eq.f32.partialorder %v235_v25, %v880_v26  ;;  %v278_v30 = vrot.slane %v211_v23, %v877_v21  ;;  %vm268_vm5 = vcmp.eq.f32.partialorder %v236_v29, %v880_v26 }
  0x2e   : > { %v209_v31 = vadd.f32 1.0, %v208_v27  ;;  %v212_v32 = vsub.f32 %v568_v22, %v208_v27  ;;  %vm216_vm8 = vcmp.ge.f32.partialorder %v208_v27, 0.0  ;;  %vm217_vm9 = vcmp.le.f32.partialorder %v208_v27, 15.0 }
  0x2f   : > { %vm218_vm10 = vmand %vm216_vm8, %vm217_vm9  ;;  %v240_v33 = vrot.slane %v208_v27, %v877_v21  ;;  %v227_v34 = vsel %vm226_vm3, %v215_v28, 0.0  ;;  %v231_v35 = vsel %vm230_vm6, %v214_v24, 0.0  ;;  %vm279_vm11 = vcmp.eq.f32.partialorder %v235_v25, %v278_v30 }
  0x30   : > { %v213_v36 = vsub.f32 1.0, %v212_v32  ;;  %vm220_vm12 = vcmp.ge.f32.partialorder %v209_v31, 0.0  ;;  %vm221_vm13 = vcmp.le.f32.partialorder %v209_v31, 15.0  ;;  %v252_v37 = vrot.slane %v209_v31, %v877_v21 }
  0x31   : > { %vm222_vm14 = vmand %vm220_vm12, %vm221_vm13  ;;  %vm241_vm15 = vcmp.eq.f32.partialorder %v235_v25, %v240_v33  ;;  %vm242_vm1 = vcmp.eq.f32.partialorder %v236_v29, %v240_v33  ;;  %v272_v38 = vrot.slane %v227_v34, %v877_v21  ;;  %v284_v39 = vrot.slane %v231_v35, %v877_v21 }
  0x32   : > { %v219_v40 = vsel %vm218_vm10, %v213_v36, 0.0  ;;  %v223_v41 = vsel %vm222_vm14, %v212_v32, 0.0  ;;  %vm253_vm2 = vcmp.eq.f32.partialorder %v235_v25, %v252_v37  ;;  %vm254_vm4 = vcmp.eq.f32.partialorder %v236_v29, %v252_v37 }
  0x33   : > { %v246_v42 = vrot.slane %v219_v40, %v877_v21  ;;  %v258_v43 = vrot.slane %v223_v41, %v877_v21  ;;  %v396_v44 = vadd.f32 %v223_v41, %v219_v40  ;;  %v273_v45 = vsel %vm267_vm7, %v272_v38, 0.0 }
  0x34   : > { %v285_v46 = vsel %vm279_vm11, %v284_v39, 0.0  ;;  %v397_v57 = vadd.f32 %v231_v35, %v227_v34  ;;  %vm280_vm6 = vcmp.eq.f32.partialorder %v236_v29, %v278_v30  ;;  %v274_v63 = vsel %vm268_vm5, %v272_v38, 0.0 }
  0x35   : > { %v247_v47 = vsel %vm241_vm15, %v246_v42, 0.0  ;;  %v248_v48 = vsel %vm242_vm1, %v246_v42, 0.0  ;;  %v259_v49 = vsel %vm253_vm2, %v258_v43, 0.0  ;;  %v260_v50 = vsel %vm254_vm4, %v258_v43, 0.0 }
  0x36   : > { %v261_v51 = vadd.f32 %v259_v49, %v247_v47  ;;  %v262_v52 = vadd.f32 %v260_v50, %v248_v48  ;;  %v287_v53 = vadd.f32 %v285_v46, %v273_v45  ;;  %v398_v58 = vmul.f32 %v397_v57, %v396_v44 }
  0x37   : > { %v286_v0 = vsel %vm280_vm6, %v284_v39, 0.0  ;;  %vm446_vm7 = vcmask 1041408   ;;  %vm448_vm8 = vcmask 1042432  }
  0x38   : > { %v297_v54 = vpack.c.bf16 %v262_v52, %v261_v51  ;;  %vm399_vm3 = vcmp.ge.f32.partialorder %v398_v58, 0.9999  ;;  %v288_v1 = vadd.f32 %v286_v0, %v274_v63 }
  0x39   : > { %v578_v60 = vsel %vm399_vm3, 1.0, %v772_v59 }
  0x3a   : > { %590 = vmatprep.subr.bf16.mxu0 %v297_v54  ;;  %600 = vmatprep.subr.bf16.mxu1 %v297_v54  ;;  %v405_v61 = vrot.slane %v578_v60, %v877_v21 }
  0x3b   : > { %591 = vmatpush3.bf16.msra.mxu0 %v297_v54  ;;  %601 = vmatpush3.bf16.msra.mxu1 %v297_v54 }
  0x3c   : > { %v406_v62 = vmul.f32 %v405_v61, %v287_v53  ;;  %v407_v2 = vmul.f32 %v405_v61, %v288_v1 }
  0x3e   : > { %593 = vmatmul.mubr.msk.bf16.vlgmr.msra.gmra.mxu0 %vm318_vm0, %v676_v55  ;;  %597 = vmatmul.mubr.msk.bf16.vlgmr.msra.gmra.mxu1 %vm318_vm0, %v677_v56  ;;  %vm444_vm0 = vcmask 1040384  }
  0xfe   : > { %v594_v3 = vpop.f32.mrf.mxu0  ;;  %v598_v4 = vpop.f32.mrf.mxu1 }
  0xff   : > { %v417_v9 = vmul.f32 %v594_v3, %v406_v62  ;;  %v435_v10 = vmul.f32 %v598_v4, %v406_v62 }
 0x100   : > { %v365_v5 = vpop.f32.mrf.mxu0  ;;  %v381_v6 = vpop.f32.mrf.mxu1 }
 0x101   : > { %v408_v13 = vmul.f32 %v406_v62, %v365_v5  ;;  %v426_v14 = vmul.f32 %v406_v62, %v381_v6 }
 0x102   : > { %v595_v7 = vpop.f32.mrf.mxu0  ;;  %v599_v8 = vpop.f32.mrf.mxu1 }
 0x103   : > { %v418_v11 = vmul.f32 %v595_v7, %v407_v2  ;;  %v436_v12 = vmul.f32 %v599_v8, %v407_v2 }
 0x104   : > { %v368_v15 = vpop.f32.mrf.mxu0  ;;  %v384_v16 = vpop.f32.mrf.mxu1 }
 0x105   : > { %v419_v17 = vadd.f32 %v418_v11, %v417_v9  ;;  %v437_v18 = vadd.f32 %v436_v12, %v435_v10  ;;  %v409_v19 = vmul.f32 %v407_v2, %v368_v15  ;;  %v427_v20 = vmul.f32 %v407_v2, %v384_v16 }
 0x107   : > { %v420_v21 = vrot.slane %v419_v17, 4  ;;  %v438_v22 = vrot.slane %v437_v18, 4  ;;  %v410_v23 = vadd.f32 %v409_v19, %v408_v13  ;;  %v428_v24 = vadd.f32 %v427_v20, %v426_v14 }
 0x109   : > { %v421_v25 = vadd.f32 %v420_v21, %v419_v17  ;;  %v439_v26 = vadd.f32 %v438_v22, %v437_v18  ;;  %v411_v27 = vrot.slane %v410_v23, 4  ;;  %v429_v28 = vrot.slane %v428_v24, 4 }
 0x10b   : > { %v422_v29 = vrot.slane %v421_v25, 2  ;;  %v440_v30 = vrot.slane %v439_v26, 2  ;;  %v412_v31 = vadd.f32 %v411_v27, %v410_v23  ;;  %v430_v32 = vadd.f32 %v429_v28, %v428_v24 }
 0x10d   : > { %v423_v33 = vadd.f32 %v422_v29, %v421_v25  ;;  %v441_v34 = vadd.f32 %v440_v30, %v439_v26  ;;  %v413_v35 = vrot.slane %v412_v31, 2  ;;  %v431_v36 = vrot.slane %v430_v32, 2 }
 0x10f   : > { %v424_v37 = vrot.slane %v423_v33, 1  ;;  %v414_v38 = vadd.f32 %v413_v35, %v412_v31  ;;  %v432_v39 = vadd.f32 %v431_v36, %v430_v32  ;;  %v442_v40 = vrot.slane %v441_v34, 1 }
 0x111   : > { %v415_v41 = vrot.slane %v414_v38, 1  ;;  %v433_v42 = vrot.slane %v432_v39, 1  ;;  %v425_v43 = vadd.f32 %v424_v37, %v423_v33  ;;  %v443_v46 = vadd.f32 %v442_v40, %v441_v34 }
 0x113   : > { %v416_v44 = vadd.f32 %v415_v41, %v414_v38  ;;  %v434_v45 = vadd.f32 %v433_v42, %v432_v39 }
 0x115   : > { %v445_v47 = vsel %vm444_vm0, %v416_v44, %v425_v43 }
 0x116   : > { %v447_v48 = vsel %vm446_vm7, %v445_v47, %v434_v45 }
 0x117   : > { %v449_v49 = vsel %vm448_vm8, %v447_v48, %v443_v46 }
 0x118   : > { %450 = vst [vmem:[%s173_s4] sm:$0xf] %v449_v49 }
 0x119   : > { %691 = shalt.err (!%p688_p7)
}
 0x11a   : > { %s692_s24 = scalar_lea.hbm %s907_s12, 64  ;;  %s696_s28 = scalar_lea.hbm %s957_s2, 256 }
 0x11b   : > { %p693_p9 = scmp.ne.s32.totalorder %s907_s12, %s692_s24  ;;  %p697_p12 = scmp.lt.s32.totalorder %s907_s12, %s957_s2 }
 0x11c   : > { %p698_p13 = scmp.lt.s32.totalorder %s696_s28, %s692_s24 }
 0x11d   : > { %p694_p10 = pnand %p693_p9, %p840_p3 }
 0x11e   : > { %p699_p0 = por %p698_p13, %p697_p12 }
 0x11f   : > { %p695_p11 = pneg %p694_p10 }
 0x121   : > { %p700_p1 = pnand %p699_p0, %p695_p11 }
 0x123   : > { %703 = shalt.err (!%p700_p1)
}
 0x124   : > { %602 = dma.vmem_to_hbm [thread:$0]  (%p840_p3), %s468_s5, 64, %s907_s12, %s452_s7  }
 0x125 PF: > { %p608_p2 = scmp.ge.s32.totalorder %s770_s16, 2  ;;  %s479_s3 = sand.u32 1, %s742_s9  }
 0x126   : > { %s480_s4 = scalar_lea.sflag [#allocation3], %s479_s3 }
 0x127   : > { %p605_p4 = pnand %p608_p2, %p849_p8 }
 0x129   : > { %p606_p5 = pneg %p605_p4 }
 0x12b   : > { %737 = dma.done.wait (%p606_p5), %s480_s4, 64  }
 0x12c   : > { %739 = vsyncadd (%p606_p5), %s480_s4, 4294967232  ;;  %s15_s16 = sadd.s32 1, %s770_s16   ;;  %s960_s9 = smov %s746_s10 }
 0x12d   : > { %p12_p6 = scmp.ge.s32.totalorder %s15_s16, 6   ;;  %s961_s10 = smov %s750_s11 }
 0x12e   : > { %s962_s11 = smov %s858_s27  ;;  %s963_s12 = smov %s762_s14 }
 0x12f   : > { %s964_s13 = smov %s766_s15  ;;  %s965_s14 = smov %s968_s19 }
 0x130   : > { %s966_s15 = smov %s972_s20  ;;  %14 = sbr.rel (!%p12_p6) target bundleno = 5 (0x5), region = 66 }
 0x135   :  { %485 = vsyncpa [#allocation3], 1 }
 0x136   :  { %487 = vsyncpa [#allocation3 + $0x1], 1 }

</bundles_post_ra>
